<compile_context>
chip_gen: v5e
topology: v5e:2x2
jax: 0.10.0
libtpu: 0.0.40
codegen_flags: <defaults>
</compile_context>

<pallas_src>
import functools

import jax
import jax.numpy as jnp
from jax.experimental import pallas as pl
from jax.experimental.pallas import tpu as pltpu


_DEFAULT_VMEM_LIMIT = 48 * 1024 * 1024  # safe on every generation (v7x: 64 MiB/TC)


def _vmem_limit_bytes():
    """Generation-aware scoped-VMEM limit (~75% of physical, capped at 100 MiB)."""
    try:
        cap = int(pltpu.get_tpu_info().vmem_capacity_bytes)
    except Exception:  # query unavailable -> conservative default
        return _DEFAULT_VMEM_LIMIT
    # v5e/v6e (128 MiB) -> 96 MiB, v7x (64 MiB per TC) -> 48 MiB.
    return min((cap * 3) // 4, 100 * 1024 * 1024)


def _pick_tile_n(n_tokens, vocab, itemsize, vmem_limit_bytes):
    """Largest aligned row tile whose *true* per-step VMEM footprint fits.

    Per row of V elements we budget:
      * 2 x itemsize : double-buffered logits input block
      * 2 x itemsize : (T,V) temporaries kept in the input dtype
                       (shifted = x - mx, one-hot select)
      * 8 bytes      : f32 (T,V) temporary (exp) + slack for vreg spills
    """
    per_row = vocab * (4 * itemsize + 8)
    budget = (vmem_limit_bytes * 3) // 4          # headroom for compiler scratch
    rows = budget // per_row
    align = 16 if itemsize < 4 else 8             # sublane packing: bf16 / f32
    if rows >= n_tokens:
        return n_tokens                           # single block == full array dim
    rows = max(align, (rows // align) * align)
    # TODO(synk): if even `align` rows exceed the budget (huge V), split the
    # vocab axis with an online LSE instead of relying on the scoped limit.
    return min(rows, n_tokens)


def _ce_masked_kernel(logits_ref, targets_ref, mask_ref, out_ref, *,
                      n_tokens, tile_n, has_tail):
    """One grid step: a (tile_n, V) slab -> one f32 partial loss in SMEM."""
    x = logits_ref[...]                              # (T, V) input dtype
    tgt = targets_ref[...].astype(jnp.int32)         # (T, 1)
    msk = mask_ref[...].astype(jnp.float32)          # (T, 1)

    # Row max & shift stay in the input dtype (bf16-native on v6e/v7x);
    # exp and the big reductions run in f32.
    mx = jnp.max(x, axis=-1, keepdims=True)          # (T, 1)
    shifted = x - mx                                 # (T, V) input dtype
    sumexp = jnp.sum(jnp.exp(shifted.astype(jnp.float32)),
                     axis=-1, keepdims=True)         # (T, 1) f32

    # Target-logit gather reuses `shifted`, so mx cancels:
    #   CE = logsumexp(x) - x[tgt] = log(sumexp) - shifted[tgt]
    vocab_ids = jax.lax.broadcasted_iota(jnp.int32, (1, x.shape[-1]), 1)
    one_hot = jnp.where(vocab_ids == tgt, shifted, jnp.zeros_like(shifted))
    # Exactly one non-zero per row -> summing in the input dtype is exact.
    tgt_shifted = jnp.sum(one_hot, axis=-1, keepdims=True).astype(jnp.float32)

    loss = (jnp.log(sumexp) - tgt_shifted) * msk     # (T, 1) f32

    if has_tail:
        # Rows past the true token count (tail block reads undefined data,
        # possibly NaN/Inf) must be zeroed with an explicit select: relying on
        # the mask multiply alone is wrong because NaN * 0 = NaN.
        i = pl.program_id(0)
        row = i * tile_n + jax.lax.broadcasted_iota(jnp.int32, loss.shape, 0)
        loss = jnp.where(row < n_tokens, loss, 0.0)

    out_ref[0, 0] = jnp.sum(loss)


@jax.jit
def cross_entropy_masked(logits, targets, mask):
    """Pallas equivalent of CrossEntropyMasked.forward.

    Args:
      logits:  (B, S, V) float (f32 or bf16)
      targets: (B, S)    int
      mask:    (B, S)    binary mask
    Returns:
      scalar float32: sum_i CE(logits_i, targets_i) * mask_i
    """
    B, S, V = logits.shape
    N = B * S

    logits_flat = logits.reshape(N, V)            # no pad, no copy, no cast
    targets_flat = targets.reshape(N, 1)
    mask_flat = mask.reshape(N, 1)

    itemsize = jnp.dtype(logits.dtype).itemsize
    vmem_limit = _vmem_limit_bytes()
    tile_n = _pick_tile_n(N, V, itemsize, vmem_limit)
    num_tiles = pl.cdiv(N, tile_n)
    has_tail = (N % tile_n) != 0

    kernel = functools.partial(_ce_masked_kernel, n_tokens=N, tile_n=tile_n,
                               has_tail=has_tail)

    partials = pl.pallas_call(
        kernel,
        out_shape=jax.ShapeDtypeStruct((num_tiles, 1), jnp.float32),
        grid_spec=pltpu.PrefetchScalarGridSpec(
            num_scalar_prefetch=0,
            grid=(num_tiles,),
            in_specs=[
                pl.BlockSpec((tile_n, V), lambda i: (i, 0)),
                pl.BlockSpec((tile_n, 1), lambda i: (i, 0)),
                pl.BlockSpec((tile_n, 1), lambda i: (i, 0)),
            ],
            out_specs=pl.BlockSpec((1, 1), lambda i: (i, 0),
                                   memory_space=pltpu.SMEM),
        ),
        compiler_params=pltpu.CompilerParams(
            dimension_semantics=("parallel",),
            vmem_limit_bytes=vmem_limit,
        ),
    )(logits_flat, targets_flat, mask_flat)

    # Cheap final reduction over a handful of per-tile scalars.
    return jnp.sum(partials)


if __name__ == "__main__":
    # Small shapes consistent with (batch, seq, vocab).
    B, S, V = 2, 8, 32
    key = jax.random.PRNGKey(0)
    k1, k2, k3 = jax.random.split(key, 3)

    logits = jax.random.normal(k1, (B, S, V), dtype=jnp.float32)
    targets = jax.random.randint(k2, (B, S), 0, V, dtype=jnp.int32)
    mask = (jax.random.uniform(k3, (B, S)) > 0.3).astype(jnp.float32)

    loss = cross_entropy_masked(logits, targets, mask)
    loss = jax.block_until_ready(loss)

    # Pure-JAX reference for a correctness sanity check.
    lse = jax.scipy.special.logsumexp(logits, axis=-1)
    tgt_logit = jnp.take_along_axis(logits, targets[..., None], axis=-1)[..., 0]
    ref = jnp.sum((lse - tgt_logit) * mask)

    assert jnp.allclose(loss, ref, rtol=1e-5, atol=1e-4), (loss, ref)
    print("KERNEL_OK")
</pallas_src>

<mosaic_0001>
module attributes {stable_mosaic.version = 11 : i64} {
  func.func @_ce_masked_kernel(%arg0: i32, %arg1: memref<16x32xf32, #tpu.memory_space<vmem>>, %arg2: memref<16x1xi32, #tpu.memory_space<vmem>>, %arg3: memref<16x1xf32, #tpu.memory_space<vmem>>, %arg4: memref<1x1xf32, #tpu.memory_space<smem>>) attributes {dimension_semantics = [#tpu.dimension_semantics<parallel>], iteration_bounds = array<i64: 1>, scalar_prefetch = 0 : i64, scratch_operands = 0 : i64, tpu.core_type = #tpu.core_type<tc>, window_params = [{transform_indices = @transform_0, window_bounds = array<i64: 16, 32>}, {transform_indices = @transform_1, window_bounds = array<i64: 16, 1>}, {transform_indices = @transform_2, window_bounds = array<i64: 16, 1>}, {transform_indices = @transform_3, window_bounds = array<i64: 1, 1>}]} {
    %c0 = arith.constant 0 : index
    %c0_0 = arith.constant 0 : index
    %0 = vector.load %arg1[%c0, %c0_0] : memref<16x32xf32, #tpu.memory_space<vmem>>, vector<16x32xf32>
    %c0_1 = arith.constant 0 : index
    %c0_2 = arith.constant 0 : index
    %1 = vector.load %arg2[%c0_1, %c0_2] : memref<16x1xi32, #tpu.memory_space<vmem>>, vector<16x1xi32>
    %c0_3 = arith.constant 0 : index
    %c0_4 = arith.constant 0 : index
    %2 = vector.load %arg3[%c0_3, %c0_4] : memref<16x1xf32, #tpu.memory_space<vmem>>, vector<16x1xf32>
    %cst = arith.constant dense<0xFF800000> : vector<16xf32>
    %3 = vector.multi_reduction <maximumf>, %0, %cst [1] : vector<16x32xf32> to vector<16xf32>
    %4 = vector.shape_cast %3 : vector<16xf32> to vector<16x1xf32>
    %5 = vector.broadcast %4 : vector<16x1xf32> to vector<16x32xf32>
    %6 = arith.subf %0, %5 : vector<16x32xf32>
    %7 = math.exp %6 : vector<16x32xf32>
    %cst_5 = arith.constant dense<0.000000e+00> : vector<16xf32>
    %8 = vector.multi_reduction <add>, %7, %cst_5 [1] : vector<16x32xf32> to vector<16xf32>
    %9 = vector.shape_cast %8 : vector<16xf32> to vector<16x1xf32>
    %10 = tpu.iota {dimensions = array<i32: 1>} : vector<1x32xi32>
    %11 = vector.broadcast %10 : vector<1x32xi32> to vector<16x32xi32>
    %12 = vector.broadcast %1 : vector<16x1xi32> to vector<16x32xi32>
    %13 = arith.cmpi eq, %11, %12 : vector<16x32xi32>
    %cst_6 = arith.constant 0.000000e+00 : f32
    %14 = vector.broadcast %cst_6 : f32 to vector<16x32xf32>
    %15 = arith.select %13, %6, %14 : vector<16x32xi1>, vector<16x32xf32>
    %cst_7 = arith.constant dense<0.000000e+00> : vector<16xf32>
    %16 = vector.multi_reduction <add>, %15, %cst_7 [1] : vector<16x32xf32> to vector<16xf32>
    %17 = vector.shape_cast %16 : vector<16xf32> to vector<16x1xf32>
    %18 = math.log %9 : vector<16x1xf32>
    %19 = arith.subf %18, %17 : vector<16x1xf32>
    %20 = arith.mulf %19, %2 : vector<16x1xf32>
    %21 = vector.shape_cast %20 : vector<16x1xf32> to vector<1x16x1xf32>
    %cst_8 = arith.constant dense<0.000000e+00> : vector<1xf32>
    %22 = vector.multi_reduction <add>, %21, %cst_8 [1, 2] : vector<1x16x1xf32> to vector<1xf32>
    %23 = vector.shape_cast %22 : vector<1xf32> to vector<1x1x1xf32>
    %24 = vector.extract %23[0, 0, 0] : f32 from vector<1x1x1xf32>
    %c0_9 = arith.constant 0 : index
    %c0_10 = arith.constant 0 : index
    %25 = memref.load %arg4[%c0_9, %c0_10] : memref<1x1xf32, #tpu.memory_space<smem>>
    memref.store %24, %arg4[%c0_9, %c0_10] : memref<1x1xf32, #tpu.memory_space<smem>>
    return
  }
  func.func @transform_0(%arg0: i32) -> (i32, i32) {
    %c0_i32 = arith.constant 0 : i32
    %c0_i32_0 = arith.constant 0 : i32
    return %arg0, %c0_i32 : i32, i32
  }
  func.func @transform_1(%arg0: i32) -> (i32, i32) {
    %c0_i32 = arith.constant 0 : i32
    %c0_i32_0 = arith.constant 0 : i32
    return %arg0, %c0_i32 : i32, i32
  }
  func.func @transform_2(%arg0: i32) -> (i32, i32) {
    %c0_i32 = arith.constant 0 : i32
    %c0_i32_0 = arith.constant 0 : i32
    return %arg0, %c0_i32 : i32, i32
  }
  func.func @transform_3(%arg0: i32) -> (i32, i32) {
    %c0_i32 = arith.constant 0 : i32
    %c0_i32_0 = arith.constant 0 : i32
    return %arg0, %c0_i32 : i32, i32
  }
}

</mosaic_0001>

<bundles_post_ra>
// kernel: cross_entropy_masked.1
= control target key start
LH: loop header
LB: loop body
LE: loop exit
PB: predicated region body
PF: predicated region fallthrough
CT: control target
= control target key end

     0   :  { %vm21_vm0 = vcmask 261120   ;;  %v124_v3 = vmov 0   ;;  %s173_s0 = inlined_call_operand.vmem [shape: f32[16,32], index: 0, kind: input, shape index: {}]   ;;  %s174_s1 = inlined_call_operand.vmem [shape: s32[16,1], index: 1, kind: input, shape index: {}]   ;;  %s175_s2 = inlined_call_operand.vmem [shape: f32[16,1], index: 2, kind: input, shape index: {}]   ;;  %s176_s3 = inlined_call_operand.hbm [shape: f32[1,1], index: 3, kind: output, shape index: {}]  }
   0x1   :  { %v15_v0 = vld [vmem:[%s173_s0] sm:$0xff]  ;;  %100 = vset.pattern.permute.xlu1 %v124_v3  ;;  %101 = vset.pattern.permute.xlu0 %v124_v3 }
   0x2   :  { %v17_v1 = vld [vmem:[%s174_s1] sm:$0xff]  ;;  %v22_v2 = vsel %vm21_vm0, %v15_v0, -inf }
   0x3   :  { %8 = vsyncpa [#allocation3], 0  ;;  %23 = vmax.xlane.f32.xlu0 %v22_v2  ;;  %43 = vperm.xlu1 %100, %v17_v1   ;;  %v16_v4 = vld [vmem:[%s173_s0 + $0x8] sm:$0xff]  ;;  %v40_v7 = vlaneseq  ;;  %v19_v32 = vld [vmem:[%s175_s2] sm:$0xff]  ;;  %vm66_vm3 = vcmask 7168   ;;  %s125_s25 = smov [#allocation2]  }
   0x4   :  { %v25_v5 = vsel %vm21_vm0, %v16_v4, -inf  ;;  %v18_v6 = vld [vmem:[%s174_s1 + $0x8] sm:$0xff] }
   0x5   :  { %v41_v8 = vand.u32 127, %v40_v7  ;;  %v20_v35 = vld [vmem:[%s175_s2 + $0x8] sm:$0xff]  ;;  %s86_s2 = sshll.u32 %s176_s3, 4  ;;  %s87_s2 = int_to_ptr.hbm [resolvable:$true] %s86_s2 }
   0xb   :  { %26 = vmax.xlane.f32.xlu0 %v25_v5  ;;  %46 = vperm.xlu1 %100, %v18_v6  }
  0x75   :  { %v44_v9 = vpop.permute.xlu1 %43 }
  0x76   :  { %v24_v10 = vpop.xlane.xlu0 %23  ;;  %vm48_vm1 = vcmp.eq.s32.totalorder %v41_v8, %v44_v9 }
  0x77   :  { %v28_v11 = vsub.f32 %v15_v0, %v24_v10 }
  0x79   :  { %v30_v12 = vmul.f32 1.442695, %v28_v11  ;;  %v50_v13 = vsel %vm48_vm1, %v28_v11, 0.0 }
  0x7a   :  { %v52_v14 = vsel %vm21_vm0, %v50_v13, 0.0 }
  0x7b   :  { %102 = vpow2.f32 %v30_v12  ;;  %53 = vadd.xlane.f32.xlu0 %v52_v14 }
  0x7d   :  { %v47_v15 = vpop.permute.xlu1 %46 }
  0x7e   :  { %v27_v16 = vpop.xlane.xlu0 %26  ;;  %vm49_vm2 = vcmp.eq.s32.totalorder %v41_v8, %v47_v15 }
  0x7f   :  { %v29_v17 = vsub.f32 %v16_v4, %v27_v16 }
  0x81   :  { %v103_v18 = vpop.eup %102  ;;  %v32_v19 = vmul.f32 1.442695, %v29_v17  ;;  %v51_v20 = vsel %vm49_vm2, %v29_v17, 0.0 }
  0x82   :  { %v34_v21 = vsel %vm21_vm0, %v103_v18, 0.0  ;;  %v55_v22 = vsel %vm21_vm0, %v51_v20, 0.0 }
  0x83   :  { %104 = vpow2.f32 %v32_v19  ;;  %35 = vadd.xlane.f32.xlu2 %v34_v21  ;;  %56 = vadd.xlane.f32.xlu1 %v55_v22 }
  0x89   :  { %v105_v23 = vpop.eup %104 }
  0x8a   :  { %v37_v24 = vsel %vm21_vm0, %v105_v23, 0.0 }
  0x8b   :  { %38 = vadd.xlane.f32.xlu2 %v37_v24 }
  0xee   :  { %v54_v29 = vpop.xlane.xlu0 %53 }
  0xf6   :  { %v36_v25 = vpop.xlane.xlu2 %35  ;;  %v57_v34 = vpop.xlane.xlu1 %56 }
  0xf7   :  { %106 = vlog2.f32 %v36_v25 }
  0xfd   :  { %v107_v26 = vpop.eup %106 }
  0xfe   :  { %v39_v27 = vpop.xlane.xlu2 %38  ;;  %v59_v28 = vmul.f32 0.6931472, %v107_v26 }
  0xff   :  { %108 = vlog2.f32 %v39_v27 }
 0x100   :  { %v62_v30 = vsub.f32 %v59_v28, %v54_v29 }
 0x102   :  { %v64_v37 = vmul.f32 %v62_v30, %v19_v32 }
 0x104   :  { %v67_v39 = vsel %vm66_vm3, %v64_v37, 0.0 }
 0x105   :  { %v109_v31 = vpop.eup %108 }
 0x106   :  { %v61_v33 = vmul.f32 0.6931472, %v109_v31 }
 0x108   :  { %v63_v36 = vsub.f32 %v61_v33, %v57_v34 }
 0x10a   :  { %v65_v38 = vmul.f32 %v63_v36, %v20_v35 }
 0x10c   :  { %v68_v40 = vsel %vm66_vm3, %v65_v38, 0.0 }
 0x10d   :  { %v69_v41 = vadd.f32 %v68_v40, %v67_v39 }
 0x10f   :  { %70 = vadd.xlane.f32.xlu2 %v69_v41 }
 0x182   :  { %v71_v42 = vpop.xlane.xlu2 %70 }
 0x183   :  { %v72_v43 = vrot.slane %v71_v42, 4 }
 0x185   :  { %v73_v44 = vadd.f32 %v72_v43, %v71_v42 }
 0x187   :  { %v74_v45 = vrot.slane %v73_v44, 2 }
 0x189   :  { %v75_v46 = vadd.f32 %v74_v45, %v73_v44 }
 0x18b   :  { %v76_v47 = vrot.slane %v75_v46, 1 }
 0x18d   :  { %v77_v48 = vadd.f32 %v76_v47, %v75_v46 }
 0x18f   :  { %96 = vpush %v77_v48 }
 0x1c0   :  { %s97_s24 = spop %96 }
 0x1c1   :  { %80 = sst [smem:[#allocation2]] %s97_s24 }
 0x1c2   :  { %89 = dma.smem_to_hbm %s125_s25, 16, %s87_s2, [#allocation3]  }
 0x1c3   :  { %122 = dma.done.wait [#allocation3], 16  }
 0x1c4   :  { %123 = vsyncadd [#allocation3], 4294967280 }
 0x1c5   :  { %94 = sfence }
 0x1c6   :  { %95 = vsyncpa [#allocation3], 1 }

</bundles_post_ra>
